<compile_context>
chip_gen: v6e
topology: v6e:2x2x1
jax: 0.10.0
libtpu: 0.0.40
codegen_flags: <defaults>
</compile_context>

<pallas_src>
import functools
import numpy as np
import jax
import jax.numpy as jnp
from jax.experimental import pallas as pl
from jax.experimental.pallas import tpu as pltpu

EPS = 1e-6      # module EPS
BN_EPS = 1e-5   # torch BatchNorm default eps

_GENS = np.stack([
    np.array([[0, 0, 0], [0, 0, -1], [0, 1, 0]], np.float32),   # X
    np.array([[0, 0, 1], [0, 0, 0], [-1, 0, 0]], np.float32),   # Y
    np.array([[0, -1, 0], [1, 0, 0], [0, 0, 0]], np.float32),   # Z
])

_COMPILER_PARAMS = pltpu.CompilerParams(
    dimension_semantics=("parallel",),          # per-tile independent -> megacore-shardable
    vmem_limit_bytes=48 * 1024 * 1024,          # above the 16/32 MiB defaults, below v7x physical
)

# TODO(synk): bf16 MXU operands (v6e/v7x micro-opt) intentionally not applied to keep f32 parity
#             with the PyTorch module; BN running-stats buffers / eval mode are not tracked.


def _round_up(v, m):
    return ((v + m - 1) // m) * m


# ----------------------------- Pallas kernels -----------------------------
def _vn_phase1_kernel(equiv,
                      x_ref, w_ref, b_ref, m_ref, proj_ref,
                      p_ref, d_ref, ssum_ref, ssq_ref, ld_ref, nrm_ref):
    """Fused linear + dense(Lie) terms + BN statistics + regularization partials for one M tile."""
    mt = x_ref.shape[-1]
    cout = p_ref.shape[1]
    t = pl.program_id(0)

    # One wide MXU matmul per tile: [NBIG, 3Cin] @ [3Cin, Mt]
    y = jnp.dot(w_ref[...], x_ref[...], preferred_element_type=jnp.float32) + b_ref[...]

    if equiv:
        ps = [y[j * cout:(j + 1) * cout, :] for j in range(3)]
        ds = [y[(3 + j) * cout:(4 + j) * cout, :] for j in range(3)]
    else:
        proj = proj_ref[0, 0]
        wx = y[0:3 * cout, :]                                    # dense_lin(x) rows (j*Cout+c)
        ps = [y[(3 + j) * cout:(4 + j) * cout, :] + proj * wx[j * cout:(j + 1) * cout, :]
              for j in range(3)]
        ds = [y[(6 + j) * cout:(7 + j) * cout, :]
              + proj * y[(9 + j) * cout:(10 + j) * cout, :]
              for j in range(3)]

    for j in range(3):
        p_ref[j] = ps[j]
        d_ref[j] = ds[j]

    # --- BatchNorm statistics (masked against M padding) ---
    norm = jnp.sqrt(ps[0] * ps[0] + ps[1] * ps[1] + ps[2] * ps[2]) + EPS     # [Cout, Mt]
    lane = jax.lax.broadcasted_iota(jnp.int32, (1, mt), 1)
    valid = (lane + t * mt) < m_ref[0, 0]
    nmask = jnp.where(valid, norm, 0.0)
    ssum_ref[...] = jnp.sum(nmask, axis=1, keepdims=True)[None]              # [1, Cout, 1]
    ssq_ref[...] = jnp.sum(nmask * norm, axis=1, keepdims=True)[None]

    # --- Lie-bracket regularization partial sums (generators pre-folded into the weights) ---
    if equiv:
        ld_ref[...] = jnp.zeros((1, 1, 1), jnp.float32)
        nrm_ref[...] = jnp.zeros((1, 1, 1), jnp.float32)
    else:
        diff = jnp.where(valid, y[12 * cout:21 * cout, :], 0.0)
        wxm = jnp.where(valid, wx, 0.0)
        ld_ref[...] = jnp.sum(diff * diff, keepdims=True)[None]
        nrm_ref[...] = jnp.sum(wxm * wxm, keepdims=True)[None]


def _bn_act(negative_slope, p_ref, d_ref, aff_ref):
    """Shared VNBatchNorm (pre-folded affine) + VN leaky ReLU body; returns 3 [Cout, Mt] tiles."""
    p0, p1, p2 = p_ref[0], p_ref[1], p_ref[2]
    d0, d1, d2 = d_ref[0], d_ref[1], d_ref[2]
    norm = jnp.sqrt(p0 * p0 + p1 * p1 + p2 * p2) + EPS
    factor = aff_ref[0] + aff_ref[1] / norm                      # norm_bn / norm
    q0, q1, q2 = p0 * factor, p1 * factor, p2 * factor
    dot = q0 * d0 + q1 * d1 + q2 * d2
    dsq = d0 * d0 + d1 * d1 + d2 * d2
    coef = dot / (dsq + EPS)
    g = jnp.where(dot < 0.0, (1.0 - negative_slope) * coef, 0.0)
    return q0 - g * d0, q1 - g * d1, q2 - g * d2


def _vn_phase2_kernel(negative_slope, p_ref, d_ref, aff_ref, out_ref):
    o0, o1, o2 = _bn_act(negative_slope, p_ref, d_ref, aff_ref)
    out_ref[0] = o0
    out_ref[1] = o1
    out_ref[2] = o2


def _vn_phase2_std_kernel(negative_slope, p_ref, d_ref, aff_ref, x_ref, wlin_ref,
                          xstd_ref, z_ref):
    """Layer-2 phase-2 fused with vn_lin + einsum('bijm,bjkm->bikm'); z2 never hits HBM."""
    z2 = _bn_act(negative_slope, p_ref, d_ref, aff_ref)          # 3 x [C4, Mt]
    wlin = wlin_ref[...]                                         # [3, C4]
    zs = []
    for j in range(3):
        zj = jnp.dot(wlin, z2[j], preferred_element_type=jnp.float32)   # [3, Mt]
        z_ref[j] = zj
        zs.append(zj)
    for k in range(3):
        acc = (x_ref[0] * zs[0][k:k + 1, :]
               + x_ref[1] * zs[1][k:k + 1, :]
               + x_ref[2] * zs[2][k:k + 1, :])
        xstd_ref[k] = acc                                        # [C, Mt]


# ----------------------------- host-side weight folding -----------------------------
def _perm_k(w, cin):
    """torch K order (i*3 + j)  ->  kernel K order (j*cin + i)."""
    out = w.shape[0]
    return jnp.transpose(w.reshape(out, cin, 3), (0, 2, 1)).reshape(out, 3 * cin)


def _regroup_rows(w, cout):
    """torch row order (c*3 + j)  ->  kernel row order (j*cout + c)."""
    k = w.shape[1]
    return jnp.transpose(w.reshape(cout, 3, k), (1, 0, 2)).reshape(3 * cout, k)


def _fuse_layer_weights(p, cin, cout, equiv):
    """Build the single [NBIG, 3Cin] weight (and [NBIG,1] bias) used by the phase-1 kernel."""
    w_feat = p["w_feat"]                                         # [Cout, Cin]
    w_dir = p["w_dir"]
    feat_blk = jnp.kron(jnp.eye(3, dtype=jnp.float32), w_feat)   # rows j*Cout+c, cols j*Cin+i
    dir_blk = jnp.kron(jnp.eye(3, dtype=jnp.float32), w_dir)
    if equiv:
        wbig = jnp.concatenate([feat_blk, dir_blk], axis=0)
        return wbig, jnp.zeros((wbig.shape[0], 1), jnp.float32)

    wd = p["w_dense"]                                            # [3Cout, 3Cin] (torch layout)
    bd = p["b_dense"]                                            # [3Cout]
    wd_perm = _perm_k(wd, cin)
    wdd_perm = _perm_k(p["w_dense_dir"], cin)
    wx_blk = _regroup_rows(wd_perm, cout)
    dd_blk = _regroup_rows(wdd_perm, cout)
    b_wx = jnp.transpose(bd.reshape(cout, 3)).reshape(3 * cout)

    # Fold the (sparse, +-1) Lie generators into the dense weights:
    #   diff_a = (Wd @ G_a - H_a @ Wd_perm) @ x_cl + (b - H_a @ b)
    eye_in = np.eye(cin, dtype=np.float32)
    eye_out = np.eye(cout, dtype=np.float32)
    d_blocks, e_blocks = [], []
    for a in range(3):
        ma = _GENS[:, a, :]                                      # [3, 3]
        ga = jnp.asarray(np.kron(ma, eye_in))                    # [3Cin, 3Cin]
        ha = jnp.asarray((ma[:, None, None, :] * eye_out[None, :, :, None])
                         .reshape(3 * cout, 3 * cout))           # [3Cout, 3Cout]
        d_blocks.append(jnp.dot(wd, ga) - jnp.dot(ha, wd_perm))
        e_blocks.append(bd - jnp.dot(ha, bd))

    wbig = jnp.concatenate([wx_blk, feat_blk, dir_blk, dd_blk] + d_blocks, axis=0)
    zb = jnp.zeros((3 * cout,), jnp.float32)
    bbig = jnp.concatenate([b_wx, zb, zb, zb] + e_blocks, axis=0)[:, None]
    return wbig, bbig


# ----------------------------- layer wrappers -----------------------------
def _vn_layer_phase1(layer_params, x_rows, m_true, mpad, mt, cin, cout, equiv, proj):
    num_tiles = mpad // mt
    wbig, bbig = _fuse_layer_weights(layer_params, cin, cout, equiv)
    nbig = wbig.shape[0]
    m_arr = jnp.full((1, 1), m_true, dtype=jnp.int32)
    proj_arr = jnp.full((1, 1), proj, dtype=jnp.float32)

    p, d, ssum, ssq, ldp, nrmp = pl.pallas_call(
        functools.partial(_vn_phase1_kernel, bool(equiv)),
        grid=(num_tiles,),
        in_specs=[
            pl.BlockSpec((3 * cin, mt), lambda t: (0, t)),
            pl.BlockSpec((nbig, 3 * cin), lambda t: (0, 0)),
            pl.BlockSpec((nbig, 1), lambda t: (0, 0)),
            pl.BlockSpec(memory_space=pltpu.MemorySpace.SMEM),
            pl.BlockSpec(memory_space=pltpu.MemorySpace.SMEM),
        ],
        out_specs=[
            pl.BlockSpec((3, cout, mt), lambda t: (0, 0, t)),
            pl.BlockSpec((3, cout, mt), lambda t: (0, 0, t)),
            pl.BlockSpec((1, cout, 1), lambda t: (t, 0, 0)),
            pl.BlockSpec((1, cout, 1), lambda t: (t, 0, 0)),
            pl.BlockSpec((1, 1, 1), lambda t: (t, 0, 0)),
            pl.BlockSpec((1, 1, 1), lambda t: (t, 0, 0)),
        ],
        out_shape=[
            jax.ShapeDtypeStruct((3, cout, mpad), jnp.float32),
            jax.ShapeDtypeStruct((3, cout, mpad), jnp.float32),
            jax.ShapeDtypeStruct((num_tiles, cout, 1), jnp.float32),
            jax.ShapeDtypeStruct((num_tiles, cout, 1), jnp.float32),
            jax.ShapeDtypeStruct((num_tiles, 1, 1), jnp.float32),
            jax.ShapeDtypeStruct((num_tiles, 1, 1), jnp.float32),
        ],
        compiler_params=_COMPILER_PARAMS,
    )(x_rows, wbig, bbig, m_arr, proj_arr)

    # Tiny cross-tile reductions + BN affine fold (training-mode batch stats, biased variance).
    mean = jnp.sum(ssum[:, :, 0], axis=0) / float(m_true)
    ex2 = jnp.sum(ssq[:, :, 0], axis=0) / float(m_true)
    var = jnp.maximum(ex2 - mean * mean, 0.0)
    a = layer_params["bn_w"] / jnp.sqrt(var + BN_EPS)
    b = layer_params["bn_b"] - mean * a
    aff = jnp.stack([a, b], axis=0)[:, :, None]                  # [2, Cout, 1]

    # p-branch and d-branch regularizers in the reference are identical (both use dense_lin) -> x2
    ld = 2.0 * jnp.sum(ldp)
    nrm = 2.0 * jnp.sum(nrmp)
    return p, d, aff, ld, nrm


def _vn_layer_phase2(p, d, aff, mpad, mt, cout, negative_slope):
    num_tiles = mpad // mt
    return pl.pallas_call(
        functools.partial(_vn_phase2_kernel, float(negative_slope)),
        grid=(num_tiles,),
        in_specs=[
            pl.BlockSpec((3, cout, mt), lambda t: (0, 0, t)),
            pl.BlockSpec((3, cout, mt), lambda t: (0, 0, t)),
            pl.BlockSpec((2, cout, 1), lambda t: (0, 0, 0)),
        ],
        out_specs=pl.BlockSpec((3, cout, mt), lambda t: (0, 0, t)),
        out_shape=jax.ShapeDtypeStruct((3, cout, mpad), jnp.float32),
        compiler_params=_COMPILER_PARAMS,
    )(p, d, aff)


def _vn_layer_phase2_std(p, d, aff, x_cl, w_lin, mpad, mt, c_in, c4, negative_slope):
    num_tiles = mpad // mt
    return pl.pallas_call(
        functools.partial(_vn_phase2_std_kernel, float(negative_slope)),
        grid=(num_tiles,),
        in_specs=[
            pl.BlockSpec((3, c4, mt), lambda t: (0, 0, t)),
            pl.BlockSpec((3, c4, mt), lambda t: (0, 0, t)),
            pl.BlockSpec((2, c4, 1), lambda t: (0, 0, 0)),
            pl.BlockSpec((3, c_in, mt), lambda t: (0, 0, t)),
            pl.BlockSpec((3, c4), lambda t: (0, 0)),
        ],
        out_specs=[
            pl.BlockSpec((3, c_in, mt), lambda t: (0, 0, t)),
            pl.BlockSpec((3, 3, mt), lambda t: (0, 0, t)),
        ],
        out_shape=[
            jax.ShapeDtypeStruct((3, c_in, mpad), jnp.float32),
            jax.ShapeDtypeStruct((3, 3, mpad), jnp.float32),
        ],
        compiler_params=_COMPILER_PARAMS,
    )(p, d, aff, x_cl, w_lin)


# ----------------------------- full module forward -----------------------------
def vn_std_feature_dual_forward(params, x, equiv, proj, negative_slope=0.2, tile_m=512):
    B, C, _, N = x.shape
    M = B * N
    c2, c4 = C // 2, C // 4

    mt = min(int(tile_m), _round_up(M, 128))
    mt = _round_up(mt, 128)
    mpad = _round_up(M, mt)

    # [B, C, 3, N] -> [3, C, M] (points on lanes), zero-padded along M (padding is masked in-kernel)
    x_cl = jnp.transpose(x, (2, 1, 0, 3)).reshape(3, C, M)
    x_cl = jnp.pad(x_cl, ((0, 0), (0, 0), (0, mpad - M)))

    p1, d1, aff1, ld1, n1 = _vn_layer_phase1(
        params["vn1"], x_cl.reshape(3 * C, mpad), M, mpad, mt, C, c2, equiv, proj)
    z1 = _vn_layer_phase2(p1, d1, aff1, mpad, mt, c2, negative_slope)        # [3, C/2, Mpad]

    p2, d2, aff2, ld2, n2 = _vn_layer_phase1(
        params["vn2"], z1.reshape(3 * c2, mpad), M, mpad, mt, c2, c4, equiv, proj)
    x_std_cl, z_cl = _vn_layer_phase2_std(
        p2, d2, aff2, x_cl, params["w_lin"], mpad, mt, C, c4, negative_slope)

    x_std = jnp.transpose(x_std_cl[:, :, :M].reshape(3, C, B, N), (2, 1, 0, 3))   # [B, C, 3, N]
    z0 = jnp.transpose(z_cl[:, :, :M].reshape(3, 3, B, N), (2, 0, 1, 3))          # [B, 3, 3, N]
    return x_std, z0, ld1 + ld2, n1 + n2


# ----------------------------- pure-JAX reference (literal transcription) -----------------------------
_HI = jax.lax.Precision.HIGHEST


def _block_gen(channels):
    blocks = [np.kron(np.eye(channels, dtype=np.float32), g) for g in _GENS]
    return jnp.asarray(np.concatenate(blocks, axis=0).T)          # [3ch, 9ch]


def _layer_reference(p, x, equiv, proj, ns):
    B, cin, _, N = x.shape
    cout = p["w_feat"].shape[0]
    feat = jnp.einsum('bijn,ci->bcjn', x, p["w_feat"], precision=_HI)
    dirp = jnp.einsum('bijn,ci->bcjn', x, p["w_dir"], precision=_HI)
    if equiv:
        pfull, dfull = feat, dirp
        ld = jnp.float32(0.0)
        nrm = jnp.float32(0.0)
    else:
        xf = jnp.transpose(x.reshape(B, cin * 3, N), (0, 2, 1))                   # [B,N,3Cin]
        wx = jnp.matmul(xf, p["w_dense"].T, precision=_HI) + p["b_dense"]
        dd = jnp.matmul(xf, p["w_dense_dir"].T, precision=_HI)
        pfull = feat + proj * jnp.transpose(wx, (0, 2, 1)).reshape(B, cout, 3, N)
        dfull = dirp + proj * jnp.transpose(dd, (0, 2, 1)).reshape(B, cout, 3, N)
        gin, gout = _block_gen(cin), _block_gen(cout)
        t1 = jnp.matmul(xf, gin, precision=_HI).reshape(B * N, cin * 3, 3).transpose(0, 2, 1)
        wa = jnp.matmul(t1, p["w_dense"].T, precision=_HI) + p["b_dense"]
        aw = jnp.matmul(wx, gout, precision=_HI).reshape(B * N, cout * 3, 3).transpose(0, 2, 1)
        ld = 2.0 * jnp.sum((wa - aw) ** 2)
        nrm = 2.0 * jnp.sum(wx ** 2)
    norm = jnp.sqrt(jnp.sum(pfull * pfull, axis=2)) + EPS                         # [B,Cout,N]
    mean = jnp.mean(norm, axis=(0, 2), keepdims=True)
    var = jnp.mean((norm - mean) ** 2, axis=(0, 2), keepdims=True)
    norm_bn = ((norm - mean) / jnp.sqrt(var + BN_EPS)
               * p["bn_w"][None, :, None] + p["bn_b"][None, :, None])
    pbn = pfull / norm[:, :, None, :] * norm_bn[:, :, None, :]
    dot = jnp.sum(pbn * dfull, axis=2, keepdims=True)
    mask = (dot >= 0).astype(jnp.float32)
    dsq = jnp.sum(dfull * dfull, axis=2, keepdims=True)
    out = ns * pbn + (1 - ns) * (mask * pbn + (1 - mask) * (pbn - dot / (dsq + EPS) * dfull))
    return out, ld, nrm


def vn_std_feature_dual_reference(params, x, equiv, proj, ns=0.2):
    z1, ld1, n1 = _layer_reference(params["vn1"], x, equiv, proj, ns)
    z2, ld2, n2 = _layer_reference(params["vn2"], z1, equiv, proj, ns)
    z0 = jnp.einsum('bcjn,kc->bkjn', z2, params["w_lin"], precision=_HI)
    z0 = jnp.transpose(z0, (0, 2, 1, 3))                                          # [B, 3, 3, N]
    x_std = jnp.einsum('bijn,bjkn->bikn', x, z0, precision=_HI)
    return x_std, z0, ld1 + ld2, n1 + n2


# ----------------------------- deterministic parameter init -----------------------------
def init_vn_layer_params(key, cin, cout):
    ks = jax.random.split(key, 5)
    lim1 = 1.0 / np.sqrt(cin)
    lim2 = 1.0 / np.sqrt(3 * cin)
    return dict(
        w_feat=jax.random.uniform(ks[0], (cout, cin), jnp.float32, -lim1, lim1),        # map_to_feat
        w_dir=jax.random.uniform(ks[1], (cout, cin), jnp.float32, -lim1, lim1),         # map_to_dir
        w_dense=jax.random.uniform(ks[2], (3 * cout, 3 * cin), jnp.float32, -lim2, lim2),
        b_dense=jax.random.uniform(ks[3], (3 * cout,), jnp.float32, -lim2, lim2),
        w_dense_dir=jax.random.uniform(ks[4], (3 * cout, 3 * cin), jnp.float32, -lim2, lim2),
        bn_w=jnp.ones((cout,), jnp.float32),
        bn_b=jnp.zeros((cout,), jnp.float32),
    )


def init_params(key, in_channels):
    k1, k2, k3 = jax.random.split(key, 3)
    c2, c4 = in_channels // 2, in_channels // 4
    lim = 1.0 / np.sqrt(c4)
    return dict(
        vn1=init_vn_layer_params(k1, in_channels, c2),
        vn2=init_vn_layer_params(k2, c2, c4),
        w_lin=jax.random.uniform(k3, (3, c4), jnp.float32, -lim, lim),   # vn_lin (normalize_frame=False)
    )


# ----------------------------- main -----------------------------
if __name__ == "__main__":
    key = jax.random.PRNGKey(0)
    kx, kp = jax.random.split(key)
    B, C, N = 2, 8, 80                      # M = 160 -> 2 tiles of 128 (exercises masking / grid)
    x = jax.random.normal(kx, (B, C, 3, N), jnp.float32)
    params = init_params(kp, C)

    for equiv, proj in ((False, 0.7), (True, 0.0)):
        x_std, z0, ld, nrm = vn_std_feature_dual_forward(
            params, x, equiv=equiv, proj=proj, tile_m=128)
        jax.block_until_ready((x_std, z0, ld, nrm))
        assert x_std.shape == (B, C, 3, N)
        assert z0.shape == (B, 3, 3, N)

        r_std, r_z0, r_ld, r_nrm = vn_std_feature_dual_reference(
            params, x, equiv=equiv, proj=proj)
        np.testing.assert_allclose(np.asarray(x_std), np.asarray(r_std), rtol=5e-2, atol=5e-2)
        np.testing.assert_allclose(np.asarray(z0), np.asarray(r_z0), rtol=5e-2, atol=5e-2)
        np.testing.assert_allclose(np.asarray(ld), np.asarray(r_ld), rtol=5e-2, atol=1e-3)
        np.testing.assert_allclose(np.asarray(nrm), np.asarray(r_nrm), rtol=5e-2, atol=1e-3)

    print("KERNEL_OK")
</pallas_src>

<mosaic_0001>
module attributes {stable_mosaic.version = 11 : i64} {
  func.func @_vn_phase1_kernel(%arg0: i32, %arg1: memref<24x128xf32, #tpu.memory_space<vmem>>, %arg2: memref<84x24xf32, #tpu.memory_space<vmem>>, %arg3: memref<84x1xf32, #tpu.memory_space<vmem>>, %arg4: memref<1x1xi32, #tpu.memory_space<smem>>, %arg5: memref<1x1xf32, #tpu.memory_space<smem>>, %arg6: memref<3x4x128xf32, #tpu.memory_space<vmem>>, %arg7: memref<3x4x128xf32, #tpu.memory_space<vmem>>, %arg8: memref<1x4x1xf32, #tpu.memory_space<vmem>>, %arg9: memref<1x4x1xf32, #tpu.memory_space<vmem>>, %arg10: memref<1x1x1xf32, #tpu.memory_space<vmem>>, %arg11: memref<1x1x1xf32, #tpu.memory_space<vmem>>) attributes {dimension_semantics = [#tpu.dimension_semantics<parallel>], iteration_bounds = array<i64: 2>, scalar_prefetch = 0 : i64, scratch_operands = 0 : i64, tpu.core_type = #tpu.core_type<tc>, window_params = [{transform_indices = @transform_0, window_bounds = array<i64: 24, 128>}, {pipeline_mode = #tpu.pipeline_mode<synchronous>, transform_indices = @transform_1, window_bounds = array<i64: 84, 24>}, {pipeline_mode = #tpu.pipeline_mode<synchronous>, transform_indices = @transform_2, window_bounds = array<i64: 84, 1>}, {transform_indices = @transform_3, window_bounds = array<i64: 1, 1>}, {transform_indices = @transform_4, window_bounds = array<i64: 1, 1>}, {transform_indices = @transform_5, window_bounds = array<i64: 3, 4, 128>}, {transform_indices = @transform_6, window_bounds = array<i64: 3, 4, 128>}, {transform_indices = @transform_7, window_bounds = array<i64: 1, 4, 1>}, {transform_indices = @transform_8, window_bounds = array<i64: 1, 4, 1>}, {transform_indices = @transform_9, window_bounds = array<i64: 1, 1, 1>}, {transform_indices = @transform_10, window_bounds = array<i64: 1, 1, 1>}]} {
    %c0 = arith.constant 0 : index
    %c0_0 = arith.constant 0 : index
    %0 = vector.load %arg2[%c0, %c0_0] : memref<84x24xf32, #tpu.memory_space<vmem>>, vector<84x24xf32>
    %c0_1 = arith.constant 0 : index
    %c0_2 = arith.constant 0 : index
    %1 = vector.load %arg1[%c0_1, %c0_2] : memref<24x128xf32, #tpu.memory_space<vmem>>, vector<24x128xf32>
    %cst = arith.constant dense<0.000000e+00> : vector<84x128xf32>
    %2 = tpu.matmul %0, %1, %cst {dimension_numbers = #tpu.dot_dimension_numbers<[1], [0], [0], [1], [0, 0, 1, 1], [], []>} : vector<84x24xf32>, vector<24x128xf32>, vector<84x128xf32> -> vector<84x128xf32>
    %c0_3 = arith.constant 0 : index
    %c0_4 = arith.constant 0 : index
    %3 = vector.load %arg3[%c0_3, %c0_4] : memref<84x1xf32, #tpu.memory_space<vmem>>, vector<84x1xf32>
    %4 = vector.broadcast %3 : vector<84x1xf32> to vector<84x128xf32>
    %5 = arith.addf %2, %4 : vector<84x128xf32>
    %c0_5 = arith.constant 0 : index
    %c0_6 = arith.constant 0 : index
    %6 = memref.load %arg5[%c0_5, %c0_6] : memref<1x1xf32, #tpu.memory_space<smem>>
    %7 = vector.extract_strided_slice %5 {offsets = [0, 0], sizes = [12, 128], strides = [1, 1]} : vector<84x128xf32> to vector<12x128xf32>
    %8 = vector.extract_strided_slice %5 {offsets = [12, 0], sizes = [4, 128], strides = [1, 1]} : vector<84x128xf32> to vector<4x128xf32>
    %9 = vector.extract_strided_slice %7 {offsets = [0, 0], sizes = [4, 128], strides = [1, 1]} : vector<12x128xf32> to vector<4x128xf32>
    %10 = vector.broadcast %6 : f32 to vector<4x128xf32>
    %11 = arith.mulf %10, %9 : vector<4x128xf32>
    %12 = arith.addf %8, %11 : vector<4x128xf32>
    %13 = vector.extract_strided_slice %5 {offsets = [16, 0], sizes = [4, 128], strides = [1, 1]} : vector<84x128xf32> to vector<4x128xf32>
    %14 = vector.extract_strided_slice %7 {offsets = [4, 0], sizes = [4, 128], strides = [1, 1]} : vector<12x128xf32> to vector<4x128xf32>
    %15 = vector.broadcast %6 : f32 to vector<4x128xf32>
    %16 = arith.mulf %15, %14 : vector<4x128xf32>
    %17 = arith.addf %13, %16 : vector<4x128xf32>
    %18 = vector.extract_strided_slice %5 {offsets = [20, 0], sizes = [4, 128], strides = [1, 1]} : vector<84x128xf32> to vector<4x128xf32>
    %19 = vector.extract_strided_slice %7 {offsets = [8, 0], sizes = [4, 128], strides = [1, 1]} : vector<12x128xf32> to vector<4x128xf32>
    %20 = vector.broadcast %6 : f32 to vector<4x128xf32>
    %21 = arith.mulf %20, %19 : vector<4x128xf32>
    %22 = arith.addf %18, %21 : vector<4x128xf32>
    %23 = vector.extract_strided_slice %5 {offsets = [24, 0], sizes = [4, 128], strides = [1, 1]} : vector<84x128xf32> to vector<4x128xf32>
    %24 = vector.extract_strided_slice %5 {offsets = [36, 0], sizes = [4, 128], strides = [1, 1]} : vector<84x128xf32> to vector<4x128xf32>
    %25 = vector.broadcast %6 : f32 to vector<4x128xf32>
    %26 = arith.mulf %25, %24 : vector<4x128xf32>
    %27 = arith.addf %23, %26 : vector<4x128xf32>
    %28 = vector.extract_strided_slice %5 {offsets = [28, 0], sizes = [4, 128], strides = [1, 1]} : vector<84x128xf32> to vector<4x128xf32>
    %29 = vector.extract_strided_slice %5 {offsets = [40, 0], sizes = [4, 128], strides = [1, 1]} : vector<84x128xf32> to vector<4x128xf32>
    %30 = vector.broadcast %6 : f32 to vector<4x128xf32>
    %31 = arith.mulf %30, %29 : vector<4x128xf32>
    %32 = arith.addf %28, %31 : vector<4x128xf32>
    %33 = vector.extract_strided_slice %5 {offsets = [32, 0], sizes = [4, 128], strides = [1, 1]} : vector<84x128xf32> to vector<4x128xf32>
    %34 = vector.extract_strided_slice %5 {offsets = [44, 0], sizes = [4, 128], strides = [1, 1]} : vector<84x128xf32> to vector<4x128xf32>
    %35 = vector.broadcast %6 : f32 to vector<4x128xf32>
    %36 = arith.mulf %35, %34 : vector<4x128xf32>
    %37 = arith.addf %33, %36 : vector<4x128xf32>
    %c0_7 = arith.constant 0 : index
    %c0_8 = arith.constant 0 : index
    %c0_9 = arith.constant 0 : index
    %38 = vector.load %arg6[%c0_7, %c0_8, %c0_9] : memref<3x4x128xf32, #tpu.memory_space<vmem>>, vector<1x4x128xf32>
    %39 = vector.shape_cast %38 : vector<1x4x128xf32> to vector<4x128xf32>
    %40 = vector.shape_cast %12 : vector<4x128xf32> to vector<1x4x128xf32>
    tpu.vector_store %arg6[%c0_7, %c0_8, %c0_9], %40 {strides = array<i32>} : memref<3x4x128xf32, #tpu.memory_space<vmem>>, vector<1x4x128xf32>,
    %c0_10 = arith.constant 0 : index
    %c0_11 = arith.constant 0 : index
    %c0_12 = arith.constant 0 : index
    %41 = vector.load %arg7[%c0_10, %c0_11, %c0_12] : memref<3x4x128xf32, #tpu.memory_space<vmem>>, vector<1x4x128xf32>
    %42 = vector.shape_cast %41 : vector<1x4x128xf32> to vector<4x128xf32>
    %43 = vector.shape_cast %27 : vector<4x128xf32> to vector<1x4x128xf32>
    tpu.vector_store %arg7[%c0_10, %c0_11, %c0_12], %43 {strides = array<i32>} : memref<3x4x128xf32, #tpu.memory_space<vmem>>, vector<1x4x128xf32>,
    %c1 = arith.constant 1 : index
    %c0_13 = arith.constant 0 : index
    %c0_14 = arith.constant 0 : index
    %44 = vector.load %arg6[%c1, %c0_13, %c0_14] : memref<3x4x128xf32, #tpu.memory_space<vmem>>, vector<1x4x128xf32>
    %45 = vector.shape_cast %44 : vector<1x4x128xf32> to vector<4x128xf32>
    %46 = vector.shape_cast %17 : vector<4x128xf32> to vector<1x4x128xf32>
    tpu.vector_store %arg6[%c1, %c0_13, %c0_14], %46 {strides = array<i32>} : memref<3x4x128xf32, #tpu.memory_space<vmem>>, vector<1x4x128xf32>,
    %c1_15 = arith.constant 1 : index
    %c0_16 = arith.constant 0 : index
    %c0_17 = arith.constant 0 : index
    %47 = vector.load %arg7[%c1_15, %c0_16, %c0_17] : memref<3x4x128xf32, #tpu.memory_space<vmem>>, vector<1x4x128xf32>
    %48 = vector.shape_cast %47 : vector<1x4x128xf32> to vector<4x128xf32>
    %49 = vector.shape_cast %32 : vector<4x128xf32> to vector<1x4x128xf32>
    tpu.vector_store %arg7[%c1_15, %c0_16, %c0_17], %49 {strides = array<i32>} : memref<3x4x128xf32, #tpu.memory_space<vmem>>, vector<1x4x128xf32>,
    %c2 = arith.constant 2 : index
    %c0_18 = arith.constant 0 : index
    %c0_19 = arith.constant 0 : index
    %50 = vector.load %arg6[%c2, %c0_18, %c0_19] : memref<3x4x128xf32, #tpu.memory_space<vmem>>, vector<1x4x128xf32>
    %51 = vector.shape_cast %50 : vector<1x4x128xf32> to vector<4x128xf32>
    %52 = vector.shape_cast %22 : vector<4x128xf32> to vector<1x4x128xf32>
    tpu.vector_store %arg6[%c2, %c0_18, %c0_19], %52 {strides = array<i32>} : memref<3x4x128xf32, #tpu.memory_space<vmem>>, vector<1x4x128xf32>,
    %c2_20 = arith.constant 2 : index
    %c0_21 = arith.constant 0 : index
    %c0_22 = arith.constant 0 : index
    %53 = vector.load %arg7[%c2_20, %c0_21, %c0_22] : memref<3x4x128xf32, #tpu.memory_space<vmem>>, vector<1x4x128xf32>
    %54 = vector.shape_cast %53 : vector<1x4x128xf32> to vector<4x128xf32>
    %55 = vector.shape_cast %37 : vector<4x128xf32> to vector<1x4x128xf32>
    tpu.vector_store %arg7[%c2_20, %c0_21, %c0_22], %55 {strides = array<i32>} : memref<3x4x128xf32, #tpu.memory_space<vmem>>, vector<1x4x128xf32>,
    %56 = arith.mulf %12, %12 : vector<4x128xf32>
    %57 = arith.mulf %17, %17 : vector<4x128xf32>
    %58 = arith.addf %56, %57 : vector<4x128xf32>
    %59 = arith.mulf %22, %22 : vector<4x128xf32>
    %60 = arith.addf %58, %59 : vector<4x128xf32>
    %61 = math.sqrt %60 : vector<4x128xf32>
    %cst_23 = arith.constant 9.99999997E-7 : f32
    %62 = vector.broadcast %cst_23 : f32 to vector<4x128xf32>
    %63 = arith.addf %61, %62 : vector<4x128xf32>
    %64 = tpu.iota {dimensions = array<i32: 1>} : vector<1x128xi32>
    %c128_i32 = arith.constant 128 : i32
    %65 = arith.muli %arg0, %c128_i32 : i32
    %66 = vector.broadcast %65 : i32 to vector<1x128xi32>
    %67 = arith.addi %64, %66 : vector<1x128xi32>
    %c0_24 = arith.constant 0 : index
    %c0_25 = arith.constant 0 : index
    %68 = memref.load %arg4[%c0_24, %c0_25] : memref<1x1xi32, #tpu.memory_space<smem>>
    %69 = vector.broadcast %68 : i32 to vector<1x128xi32>
    %70 = arith.cmpi slt, %67, %69 : vector<1x128xi32>
    %cst_26 = arith.constant 0.000000e+00 : f32
    %71 = vector.shape_cast %70 : vector<1x128xi1> to vector<1x128xi1>
    %72 = vector.broadcast %71 : vector<1x128xi1> to vector<4x128xi1>
    %73 = vector.broadcast %cst_26 : f32 to vector<4x128xf32>
    %74 = arith.select %72, %63, %73 : vector<4x128xi1>, vector<4x128xf32>
    %cst_27 = arith.constant dense<0.000000e+00> : vector<4xf32>
    %75 = vector.multi_reduction <add>, %74, %cst_27 [1] : vector<4x128xf32> to vector<4xf32>
    %76 = vector.shape_cast %75 : vector<4xf32> to vector<4x1xf32>
    %77 = vector.shape_cast %76 : vector<4x1xf32> to vector<1x4x1xf32>
    %c0_28 = arith.constant 0 : index
    %c0_29 = arith.constant 0 : index
    %c0_30 = arith.constant 0 : index
    %78 = vector.load %arg8[%c0_28, %c0_29, %c0_30] : memref<1x4x1xf32, #tpu.memory_space<vmem>>, vector<1x4x1xf32>
    tpu.vector_store %arg8[%c0_28, %c0_29, %c0_30], %77 {strides = array<i32>} : memref<1x4x1xf32, #tpu.memory_space<vmem>>, vector<1x4x1xf32>,
    %79 = arith.mulf %74, %63 : vector<4x128xf32>
    %cst_31 = arith.constant dense<0.000000e+00> : vector<4xf32>
    %80 = vector.multi_reduction <add>, %79, %cst_31 [1] : vector<4x128xf32> to vector<4xf32>
    %81 = vector.shape_cast %80 : vector<4xf32> to vector<4x1xf32>
    %82 = vector.shape_cast %81 : vector<4x1xf32> to vector<1x4x1xf32>
    %c0_32 = arith.constant 0 : index
    %c0_33 = arith.constant 0 : index
    %c0_34 = arith.constant 0 : index
    %83 = vector.load %arg9[%c0_32, %c0_33, %c0_34] : memref<1x4x1xf32, #tpu.memory_space<vmem>>, vector<1x4x1xf32>
    tpu.vector_store %arg9[%c0_32, %c0_33, %c0_34], %82 {strides = array<i32>} : memref<1x4x1xf32, #tpu.memory_space<vmem>>, vector<1x4x1xf32>,
    %84 = vector.extract_strided_slice %5 {offsets = [48, 0], sizes = [36, 128], strides = [1, 1]} : vector<84x128xf32> to vector<36x128xf32>
    %cst_35 = arith.constant 0.000000e+00 : f32
    %85 = vector.shape_cast %70 : vector<1x128xi1> to vector<1x128xi1>
    %86 = vector.broadcast %85 : vector<1x128xi1> to vector<36x128xi1>
    %87 = vector.broadcast %cst_35 : f32 to vector<36x128xf32>
    %88 = arith.select %86, %84, %87 : vector<36x128xi1>, vector<36x128xf32>
    %cst_36 = arith.constant 0.000000e+00 : f32
    %89 = vector.shape_cast %70 : vector<1x128xi1> to vector<1x128xi1>
    %90 = vector.broadcast %89 : vector<1x128xi1> to vector<12x128xi1>
    %91 = vector.broadcast %cst_36 : f32 to vector<12x128xf32>
    %92 = arith.select %90, %7, %91 : vector<12x128xi1>, vector<12x128xf32>
    %93 = arith.mulf %88, %88 : vector<36x128xf32>
    %94 = vector.shape_cast %93 : vector<36x128xf32> to vector<1x36x128xf32>
    %cst_37 = arith.constant dense<0.000000e+00> : vector<1xf32>
    %95 = vector.multi_reduction <add>, %94, %cst_37 [1, 2] : vector<1x36x128xf32> to vector<1xf32>
    %96 = vector.shape_cast %95 : vector<1xf32> to vector<1x1x1xf32>
    %97 = vector.extract %96[0, 0, 0] : f32 from vector<1x1x1xf32>
    %98 = vector.broadcast %97 : f32 to vector<1x1xf32>
    %99 = vector.shape_cast %98 : vector<1x1xf32> to vector<1x1x1xf32>
    %c0_38 = arith.constant 0 : index
    %c0_39 = arith.constant 0 : index
    %c0_40 = arith.constant 0 : index
    %100 = vector.load %arg10[%c0_38, %c0_39, %c0_40] : memref<1x1x1xf32, #tpu.memory_space<vmem>>, vector<1x1x1xf32>
    tpu.vector_store %arg10[%c0_38, %c0_39, %c0_40], %99 {strides = array<i32>} : memref<1x1x1xf32, #tpu.memory_space<vmem>>, vector<1x1x1xf32>,
    %101 = arith.mulf %92, %92 : vector<12x128xf32>
    %102 = vector.shape_cast %101 : vector<12x128xf32> to vector<1x12x128xf32>
    %cst_41 = arith.constant dense<0.000000e+00> : vector<1xf32>
    %103 = vector.multi_reduction <add>, %102, %cst_41 [1, 2] : vector<1x12x128xf32> to vector<1xf32>
    %104 = vector.shape_cast %103 : vector<1xf32> to vector<1x1x1xf32>
    %105 = vector.extract %104[0, 0, 0] : f32 from vector<1x1x1xf32>
    %106 = vector.broadcast %105 : f32 to vector<1x1xf32>
    %107 = vector.shape_cast %106 : vector<1x1xf32> to vector<1x1x1xf32>
    %c0_42 = arith.constant 0 : index
    %c0_43 = arith.constant 0 : index
    %c0_44 = arith.constant 0 : index
    %108 = vector.load %arg11[%c0_42, %c0_43, %c0_44] : memref<1x1x1xf32, #tpu.memory_space<vmem>>, vector<1x1x1xf32>
    tpu.vector_store %arg11[%c0_42, %c0_43, %c0_44], %107 {strides = array<i32>} : memref<1x1x1xf32, #tpu.memory_space<vmem>>, vector<1x1x1xf32>,
    return
  }
  func.func @transform_0(%arg0: i32) -> (i32, i32) {
    %c0_i32 = arith.constant 0 : i32
    %c0_i32_0 = arith.constant 0 : i32
    return %c0_i32, %arg0 : i32, i32
  }
  func.func @transform_1(%arg0: i32) -> (i32, i32) {
    %c0_i32 = arith.constant 0 : i32
    %c0_i32_0 = arith.constant 0 : i32
    %c0_i32_1 = arith.constant 0 : i32
    return %c0_i32, %c0_i32_0 : i32, i32
  }
  func.func @transform_2(%arg0: i32) -> (i32, i32) {
    %c0_i32 = arith.constant 0 : i32
    %c0_i32_0 = arith.constant 0 : i32
    %c0_i32_1 = arith.constant 0 : i32
    return %c0_i32, %c0_i32_0 : i32, i32
  }
  func.func @transform_3(%arg0: i32) -> (i32, i32) {
    %c0_i32 = arith.constant 0 : i32
    %c0_i32_0 = arith.constant 0 : i32
    %c0_i32_1 = arith.constant 0 : i32
    return %c0_i32, %c0_i32_0 : i32, i32
  }
  func.func @transform_4(%arg0: i32) -> (i32, i32) {
    %c0_i32 = arith.constant 0 : i32
    %c0_i32_0 = arith.constant 0 : i32
    %c0_i32_1 = arith.constant 0 : i32
    return %c0_i32, %c0_i32_0 : i32, i32
  }
  func.func @transform_5(%arg0: i32) -> (i32, i32, i32) {
    %c0_i32 = arith.constant 0 : i32
    %c0_i32_0 = arith.constant 0 : i32
    %c0_i32_1 = arith.constant 0 : i32
    return %c0_i32, %c0_i32_0, %arg0 : i32, i32, i32
  }
  func.func @transform_6(%arg0: i32) -> (i32, i32, i32) {
    %c0_i32 = arith.constant 0 : i32
    %c0_i32_0 = arith.constant 0 : i32
    %c0_i32_1 = arith.constant 0 : i32
    return %c0_i32, %c0_i32_0, %arg0 : i32, i32, i32
  }
  func.func @transform_7(%arg0: i32) -> (i32, i32, i32) {
    %c0_i32 = arith.constant 0 : i32
    %c0_i32_0 = arith.constant 0 : i32
    %c0_i32_1 = arith.constant 0 : i32
    return %arg0, %c0_i32, %c0_i32_0 : i32, i32, i32
  }
  func.func @transform_8(%arg0: i32) -> (i32, i32, i32) {
    %c0_i32 = arith.constant 0 : i32
    %c0_i32_0 = arith.constant 0 : i32
    %c0_i32_1 = arith.constant 0 : i32
    return %arg0, %c0_i32, %c0_i32_0 : i32, i32, i32
  }
  func.func @transform_9(%arg0: i32) -> (i32, i32, i32) {
    %c0_i32 = arith.constant 0 : i32
    %c0_i32_0 = arith.constant 0 : i32
    %c0_i32_1 = arith.constant 0 : i32
    return %arg0, %c0_i32, %c0_i32_0 : i32, i32, i32
  }
  func.func @transform_10(%arg0: i32) -> (i32, i32, i32) {
    %c0_i32 = arith.constant 0 : i32
    %c0_i32_0 = arith.constant 0 : i32
    %c0_i32_1 = arith.constant 0 : i32
    return %arg0, %c0_i32, %c0_i32_0 : i32, i32, i32
  }
}

</mosaic_0001>

<bundles_post_ra>
// kernel: tpu_custom_call.1
= control target key start
LH: loop header
LB: loop body
LE: loop exit
PB: predicated region body
PF: predicated region fallthrough
CT: control target
= control target key end

     0   :  { %s1673_s0 = inlined_call_operand.vmem [shape: f32[24,256], index: 0, kind: input, shape index: {}]   ;;  %s1674_s1 = inlined_call_operand.vmem [shape: f32[84,24], index: 1, kind: input, shape index: {}]   ;;  %s1675_s2 = inlined_call_operand.vmem [shape: f32[84,1], index: 2, kind: input, shape index: {}]   ;;  %s1676_s3 = inlined_call_operand.<no memory space> [shape: s32[1,1], index: 3, kind: input, shape index: {}]   ;;  %s1677_s4 = inlined_call_operand.<no memory space> [shape: f32[1,1], index: 4, kind: input, shape index: {}]   ;;  %s1678_s5 = inlined_call_operand.hbm [shape: f32[3,4,256], index: 5, kind: output, shape index: {0}]   ;;  %s1679_s6 = inlined_call_operand.hbm [shape: f32[3,4,256], index: 6, kind: output, shape index: {1}]   ;;  %s1680_s7 = inlined_call_operand.vmem [shape: f32[2,4,1], index: 7, kind: output, shape index: {2}]   ;;  %s1681_s8 = inlined_call_operand.vmem [shape: f32[2,4,1], index: 8, kind: output, shape index: {3}]   ;;  %s1682_s9 = inlined_call_operand.vmem [shape: f32[2,1,1], index: 9, kind: output, shape index: {4}]   ;;  %s1683_s10 = inlined_call_operand.vmem [shape: f32[2,1,1], index: 10, kind: output, shape index: {5}]  }
   0x1   :  { %1689 = sst [smem:[#allocation11_spill]] %s1673_s0 }
   0x2   :  { %16 = sst [smem:[#allocation2]] %s1676_s3 }
   0x3   :  { %17 = sst [smem:[#allocation3]] %s1677_s4 }
   0x4   :  { %18 = vsyncpa [#allocation6], 0 }
   0x5   :  { %20 = vsyncpa [#allocation6 + $0x1], 0 }
   0x6   :  { %21 = vsyncpa [#allocation8], 0 }
   0x7   :  { %23 = vsyncpa [#allocation8 + $0x1], 0  ;;  %s1354_s17 = smov 0   ;;  %s1356_s18 = smov 0  }
   0x8   :  { %s1358_s19 = smov 0   ;;  %s1360_s20 = smov 0  }
   0x9 LB: > { %s1375_s3 = sadd.s32 4294967295, %s1283_s20   ;;  %s1046_s4 = sadd.s32 4294967294, %s1283_s20   ;;  %s1283_s20 = sphi %s1360_s20, %s1703_s20   ;;  %s1279_s19 = sphi %s1358_s19, %s1702_s19   ;;  %s1275_s18 = sphi %s1356_s18, %s1701_s18   ;;  %s1271_s17 = sphi %s1354_s17, %s1700_s17  }
   0xa   : > { %s1379_s21 = sadd.s32 1, %s1283_s20   ;;  %s36_s22 = sadd.s32 1, %s1279_s19 }
   0xb   : > { %s33_s23 = ssub.s32 %s1283_s20, %s1379_s21  ;;  %p43_p0 = scmp.ne.s32.totalorder %s1279_s19, %s1275_s18 }
   0xc   : > { %p34_p1 = scmp.eq.s32.totalorder %s33_s23, 0  ;;  %p44_p2 = scmp.eq.s32.totalorder %s1283_s20, 0 }
   0xd   : > { %p157_p3 = scmp.eq.s32.totalorder %s1375_s3, 1  ;;  %p162_p4 = scmp.ne.s32.totalorder %s1275_s18, %s1271_s17 }
   0xe   : > { %s1391_s24 = scalar_select %p34_p1, %s1279_s19, %s36_s22  }
   0xf   : > { %p45_p5 = por %p44_p2, %p43_p0  ;;  %p1393_p6 = por %p157_p3, %p43_p0 }
  0x10   : > { %p163_p7 = scmp.eq.s32.totalorder %s1046_s4, 1  ;;  %p1048_p9 = scmp.ge.s32.totalorder %s1283_s20, 2 }
  0x12   : > { %p1397_p8 = por %p163_p7, %p162_p4  ;;  %321 = sbr.rel (%p1048_p9) target bundleno = 35 (0x23), region = 32 }
  0x17   : > { %324 = sbr.rel (!%p45_p5) target bundleno = 35 (0x23), region = 36  ;;  %s326_s27 = sand.u32 (%p45_p5), 1, %s1279_s19  }
  0x18   : > { %s1049_s28 = sshll.u32 (%p45_p5), %s1283_s20, 3  ;;  %s1132_s29 = smul.u32 (%p45_p5), 24, %s326_s27 }
  0x19   : > { %s1692_s0 = sld [smem:[#allocation11_spill]] (%p45_p5) }
  0x1a   : > { %s328_s13 = scalar_lea.vmem (%p45_p5), [#allocation4], %s1132_s29 }
  0x1f   : > { %s330_s12 = scalar_lea.vmem %s1692_s0, %s1049_s28 }
  0x20   : > { %v363_v0 = vld [vmem:[%s330_s12] sm:$0xff]  ;;  %v365_v1 = vld [vmem:[%s330_s12 + $0x10] sm:$0xff] }
  0x21   : > { %v367_v2 = vld [vmem:[%s330_s12 + $0x20] sm:$0xff]  ;;  %364 = vst [vmem:[%s328_s13] sm:$0xff] %v363_v0  ;;  %366 = vst [vmem:[%s328_s13 + $0x8] sm:$0xff] %v365_v1 }
  0x22   : > { %368 = vst [vmem:[%s328_s13 + $0x10] sm:$0xff] %v367_v2 }
  0x23 PF: > { %p1050_p10 = scmp.ge.s32.totalorder %s1283_s20, 1  ;;  %p373_p11 = scmp.lt.s32.totalorder %s1283_s20, 3 }
  0x25   : > { %p374_p12 = pnand %p1050_p10, %p373_p11 }
  0x26   : > { %s1412_s14 = sand.u32 (!%p374_p12), 1, %s1275_s18   ;;  %s739_s23 = sld [smem:[#allocation2]] (!%p374_p12) }
  0x27   : > { %377 = sbr.rel (%p374_p12) target bundleno = 494 (0x1ee), region = 74  ;;  %s1068_s28 = sshll.u32 (!%p374_p12), %s1375_s3, 7 }
  0x28   : > { %s1133_s15 = smul.u32 (!%p374_p12), 24, %s1412_s14  ;;  %s802_s12 = scalar_lea.sflag (!%p374_p12), [#allocation6], %s1412_s14 }
  0x29   : > { %s1685_s29 = smul.u32 (!%p374_p12), 12, %s1412_s14 }
  0x2a   : > { %s382_s27 = scalar_lea.vmem (!%p374_p12), [#allocation4], %s1133_s15 }
  0x2b   : > { %s1527_s30 = scalar_lea.vmem (!%p374_p12), [#allocation5], %s1685_s29 }
  0x2c   : > { %v1285_v3 = vmov 0.0   ;;  %vm1286_vm0 = vmmov 0   ;;  %v1287_v4 = vmov 0   ;;  %v470_v5 = vld [vmem:[%s1675_s2 + $0x30] sm:$0xff]  ;;  %v472_v6 = vld [vmem:[%s1675_s2 + $0x40] sm:$0xff]  ;;  %vm530_vm1 = vcmask 195584  }
  0x2d   : > { %1087 = vmatprep.subr.mxu0 %v1285_v3  ;;  %1126 = vmatprep.subr.mxu1 %v1285_v3  ;;  %v463_v7 = vld [vmem:[%s382_s27 + $0x10] sm:$0xff]  ;;  %v462_v8 = vld [vmem:[%s382_s27 + $0x8] sm:$0xff]  ;;  %v461_v9 = vld [vmem:[%s382_s27] sm:$0xff]  ;;  %v734_v30 = vlaneseq  ;;  %s684_s27 = sld [smem:[#allocation3]]  ;;  %v737_v34 = vstv %s1068_s28  ;;  %vm771_vm3 = vcmask 1043456   ;;  %vm745_vm6 = vcmask 1047556  }
  0x2e   : > { %1093 = vmatprep.mubr.msk.f32.mxu0 %vm1286_vm0, %v1285_v3  ;;  %1111 = vmatprep.mubr.msk.f32.mxu1 %vm1286_vm0, %v1285_v3  ;;  %v450_v10 = vld [vmem:[%s1674_s1] sm:$0xff]  ;;  %v456_v11 = vld [vmem:[%s1674_s1 + $0x30] sm:$0xff]  ;;  %v471_v12 = vld [vmem:[%s1675_s2 + $0x38] sm:$0xff]  ;;  %v740_v40 = vstv %s739_s23  ;;  %s833_s16 = sshll.u32 %s1527_s30, 4  ;;  %s1684_s23 = sshll.u32 %s1375_s3, 6  ;;  %s1560_s16 = int_to_ptr.vmem [resolvable:$true] %s833_s16 }
  0x2f   : > { %1189 = vset.pattern.permute.xlu0 %v1287_v4  ;;  %1190 = vset.pattern.permute.xlu1 %v1287_v4  ;;  %v473_v13 = vld [vmem:[%s1675_s2 + $0x48] sm:$0xff]  ;;  %v457_v15 = vld [vmem:[%s1674_s1 + $0x38] sm:$0xff]  ;;  %v474_v17 = vld [vmem:[%s1675_s2 + $0x50] sm:$0xf]  ;;  %v735_v33 = vand.u32 127, %v734_v30  ;;  %s1568_s11 = scalar_lea.hbm %s1678_s5, %s1684_s23  ;;  %s1193_s13 = scalar_lea.vmem %s1560_s16, 192 }
  0x30   : > { %507 = vperm.xlu0 %1189, %v470_v5   ;;  %517 = vperm.xlu1 %1190, %v472_v6   ;;  %v451_v14 = vld [vmem:[%s1674_s1 + $0x8] sm:$0xff]  ;;  %v452_v18 = vld [vmem:[%s1674_s1 + $0x10] sm:$0xff]  ;;  %v458_v19 = vld [vmem:[%s1674_s1 + $0x40] sm:$0xff]  ;;  %p1194_p13 = scmp.ne.s32.totalorder %s1560_s16, %s1193_s13 }
  0x31   : > { %1088 = vmatpush3.msra.mxu0 %v463_v7  ;;  %1129 = vmatpush3.msra.mxu1 %v463_v7  ;;  %v465_v16 = vld [vmem:[%s1675_s2 + $0x8] sm:$0xff]  ;;  %v464_v20 = vld [vmem:[%s1675_s2] sm:$0xff]  ;;  %v466_v21 = vld [vmem:[%s1675_s2 + $0x10] sm:$0xff]  ;;  %v738_v36 = vadd.s32 %v737_v34, %v735_v33 }
  0x32   : > { %1089 = vmatprep.subr.mxu0 %v1285_v3  ;;  %1127 = vmatprep.subr.mxu1 %v1285_v3  ;;  %v459_v22 = vld [vmem:[%s1674_s1 + $0x48] sm:$0xff]  ;;  %v453_v23 = vld [vmem:[%s1674_s1 + $0x18] sm:$0xff]  ;;  %v460_v24 = vld [vmem:[%s1674_s1 + $0x50] sm:$0xf]  ;;  %p1195_p0 = pnand %p1194_p13, %p1393_p6 }
  0x33   : > { %1090 = vmatpush3.msra.mxu0 %v462_v8  ;;  %1130 = vmatpush3.msra.mxu1 %v462_v8  ;;  %v454_v25 = vld [vmem:[%s1674_s1 + $0x20] sm:$0xff]  ;;  %v455_v26 = vld [vmem:[%s1674_s1 + $0x28] sm:$0xff]  ;;  %v1512_v41 = vstv %s684_s27  ;;  %vm1515_vm2 = vcmp.lt.s32.totalorder %v738_v36, %v740_v40 }
  0x34   : > { %1091 = vmatprep.subr.mxu0 %v1285_v3  ;;  %1128 = vmatprep.subr.mxu1 %v1285_v3  ;;  %p1196_p1 = pneg %p1195_p0 }
  0x35   : > { %1092 = vmatpush3.msra.mxu0 %v461_v9  ;;  %1131 = vmatpush3.msra.mxu1 %v461_v9 }
  0x36   : > { %1094 = vmatmul.mubr.msk.f32.vlgmr.msra.gmra.mxu0 %vm530_vm1, %v450_v10  ;;  %1112 = vmatmul.mubr.msk.f32.vlgmr.msra.gmra.mxu1 %vm530_vm1, %v456_v11 }
  0x37   : > { %1096 = vmatprep.mubr.msk.f32.mxu0 %vm1286_vm0, %v1285_v3  ;;  %1114 = vmatprep.mubr.msk.f32.mxu1 %vm1286_vm0, %v1285_v3 }
  0x38   : > { %512 = vperm.xlu0 %1189, %v471_v12   ;;  %522 = vperm.xlu1 %1190, %v473_v13  }
  0x3a   : > { %1097 = vmatmul.mubr.msk.f32.gmra.mxu0 %vm530_vm1, %v451_v14  ;;  %1115 = vmatmul.mubr.msk.f32.gmra.mxu1 %vm530_vm1, %v457_v15 }
  0x3b   : > { %1099 = vmatprep.mubr.msk.f32.mxu0 %vm1286_vm0, %v1285_v3  ;;  %1117 = vmatprep.mubr.msk.f32.mxu1 %vm1286_vm0, %v1285_v3 }
  0x3c   : > { %482 = vperm.xlu0 %1189, %v465_v16   ;;  %527 = vperm.xlu1 %1190, %v474_v17  }
  0x3e   : > { %1100 = vmatmul.mubr.msk.f32.gmra.mxu0 %vm530_vm1, %v452_v18  ;;  %1118 = vmatmul.mubr.msk.f32.gmra.mxu1 %vm530_vm1, %v458_v19 }
  0x3f   : > { %1120 = vmatprep.mubr.msk.f32.mxu1 %vm1286_vm0, %v1285_v3  ;;  %1102 = vmatprep.mubr.msk.f32.mxu0 %vm1286_vm0, %v1285_v3 }
  0x40   : > { %477 = vperm.xlu0 %1189, %v464_v20   ;;  %487 = vperm.xlu1 %1190, %v466_v21  }
  0x42   : > { %1121 = vmatmul.mubr.msk.f32.gmra.mxu1 %vm530_vm1, %v459_v22  ;;  %1103 = vmatmul.mubr.msk.f32.gmra.mxu0 %vm530_vm1, %v453_v23 }
  0x43   : > { %1123 = vmatprep.mubr.msk.f32.mxu1 %vm1286_vm0, %v1285_v3  ;;  %1105 = vmatprep.mubr.msk.f32.mxu0 %vm1286_vm0, %v1285_v3 }
  0x46   : > { %1124 = vmatmul.mubr.msk.f32.gmra.mxu1 %vm530_vm1, %v460_v24  ;;  %1106 = vmatmul.mubr.msk.f32.gmra.mxu0 %vm530_vm1, %v454_v25 }
  0x47   : > { %1108 = vmatprep.mubr.msk.f32.mxu0 %vm1286_vm0, %v1285_v3 }
  0x4a   : > { %1109 = vmatmul.mubr.msk.f32.gmra.mxu0 %vm530_vm1, %v455_v26 }
  0xab   : > { %v508_v27 = vpop.permute.xlu0 %507  ;;  %v518_v29 = vpop.permute.xlu1 %517 }
  0xb3   : > { %v513_v28 = vpop.permute.xlu0 %512  ;;  %v523_v32 = vpop.permute.xlu1 %522 }
  0xb7   : > { %v483_v31 = vpop.permute.xlu0 %482  ;;  %v528_v37 = vpop.permute.xlu1 %527 }
  0xbb   : > { %v478_v35 = vpop.permute.xlu0 %477  ;;  %v488_v52 = vpop.permute.xlu1 %487 }
  0xf6   : > { %v630_v38 = vpop.f32.mrf.mxu0  ;;  %v660_v39 = vpop.f32.mrf.mxu1 }
  0xf7   : > { %v631_v42 = vadd.f32 %v630_v38, %v478_v35  ;;  %v661_v60 = vadd.f32 %v660_v39, %v508_v27 }
  0xf8   : > { %v1095_v43 = vpop.f32.mrf.mxu0  ;;  %v1113_v44 = vpop.f32.mrf.mxu1 }
  0xf9   : > { %v686_v46 = vmul.f32 %v1512_v41, %v631_v42  ;;  %v761_v47 = vsel %vm1515_vm2, %v631_v42, 0.0  ;;  %v756_v10 = vsel %vm1515_vm2, %v661_v60, 0.0 }
  0xfa   : > { %v635_v48 = vpop.f32.mrf.mxu0  ;;  %v665_v49 = vpop.f32.mrf.mxu1  ;;  %v786_v56 = vmul.f32 %v761_v47, %v761_v47  ;;  %v763_v19 = vmul.f32 %v756_v10, %v756_v10 }
  0xfb   : > { %v688_v50 = vrot.slane %v686_v46, 4  ;;  %v636_v51 = vadd.f32 %v635_v48, %v483_v31  ;;  %v666_v53 = vadd.f32 %v665_v49, %v513_v28  ;;  %v468_v46 = vld [vmem:[%s1675_s2 + $0x20] sm:$0xff] }
  0xfc   : > { %v1098_v54 = vpop.f32.mrf.mxu0  ;;  %v1116_v55 = vpop.f32.mrf.mxu1 }
  0xfd   : > { %v690_v57 = vadd.f32 %v688_v50, %v636_v51  ;;  %v692_v58 = vmul.f32 %v1512_v41, %v636_v51  ;;  %v762_v59 = vsel %vm1515_vm2, %v636_v51, 0.0  ;;  %v757_v3 = vsel %vm1515_vm2, %v666_v53, 0.0 }
  0xfe   : > { %v640_v61 = vpop.f32.mrf.mxu0  ;;  %v670_v62 = vpop.f32.mrf.mxu1  ;;  %v787_v63 = vmul.f32 %v762_v59, %v762_v59  ;;  %v764_v14 = vmul.f32 %v757_v3, %v757_v3 }
  0xff   : > { %708 = vst [vmem:[%s1527_s30 - $0x4] sm:$0xf0] %v690_v57  ;;  %v641_v0 = vadd.f32 %v640_v61, %v488_v52  ;;  %v694_v1 = vrot.slane %v692_v58, 4  ;;  %v671_v2 = vadd.f32 %v670_v62, %v518_v29  ;;  %v718_v27 = vmul.f32 %v690_v57, %v690_v57 }
 0x100   : > { %v1119_v4 = vpop.f32.mrf.mxu1  ;;  %v788_v5 = vsel %vm771_vm3, %v787_v63, 0.0  ;;  %v1101_v6 = vpop.f32.mrf.mxu0  ;;  %v768_v24 = vadd.f32 %v764_v14, %v763_v19 }
 0x101   : > { %v691_v7 = vadd.f32 %v688_v50, %v641_v0  ;;  %v696_v8 = vadd.f32 %v694_v1, %v641_v0  ;;  %v789_v9 = vadd.f32 %v788_v5, %v786_v56  ;;  %v758_v11 = vsel %vm1515_vm2, %v671_v2, 0.0  ;;  %v467_v56 = vld [vmem:[%s1675_s2 + $0x18] sm:$0xff] }
 0x102   : > { %v675_v12 = vpop.f32.mrf.mxu1  ;;  %v1537_v13 = vpop.f32.mrf.mxu0  ;;  %v765_v20 = vmul.f32 %v758_v11, %v758_v11 }
 0x103   : > { %1064 = vst [vmem:[%s1527_s30 + $0x4] sm:$0xf] %v691_v7  ;;  %1066 = vst [vmem:[%s1527_s30 + $0x4] sm:$0xf0] %v696_v8  ;;  %v719_v15 = vmul.f32 %v691_v7, %v691_v7  ;;  %v676_v16 = vadd.f32 %v675_v12, %v523_v32  ;;  %790 = vadd.xlane.f32.xlu1 %v789_v9  ;;  %v724_v34 = vmul.f32 %v696_v8, %v696_v8  ;;  %s1288_s30 = smov [#allocation5]  }
 0x104   : > { %v1122_v17 = vpop.f32.mrf.mxu1  ;;  %v1104_v18 = vpop.f32.mrf.mxu0  ;;  %v769_v29 = vadd.f32 %v768_v24, %v765_v20  ;;  %s1197_s15 = sshll.u32 %s1288_s30, 4  ;;  %s1198_s15 = int_to_ptr.vmem [resolvable:$false] %s1197_s15 }
 0x105   : > { %v759_v21 = vsel %vm1515_vm2, %v676_v16, 0.0  ;;  %v721_v22 = vrot.slane %v719_v15, 4  ;;  %s1199_s4 = scalar_lea.vmem %s1198_s15, 384  ;;  %p1200_p2 = scmp.lt.s32.totalorder %s1560_s16, %s1198_s15 }
 0x106   : > { %v680_v23 = vpop.f32.mrf.mxu1  ;;  %v766_v25 = vmul.f32 %v759_v21, %v759_v21  ;;  %v1546_v36 = vpop.f32.mrf.mxu0  ;;  %p1201_p3 = scmp.lt.s32.totalorder %s1199_s4, %s1193_s13 }
 0x107   : > { %v681_v26 = vadd.f32 %v680_v23, %v528_v37  ;;  %v723_v31 = vadd.f32 %v721_v22, %v718_v27  ;;  %v469_v37 = vld [vmem:[%s1675_s2 + $0x28] sm:$0xff] }
 0x108   : > { %v1125_v28 = vpop.f32.mrf.mxu1  ;;  %v770_v33 = vadd.f32 %v769_v29, %v766_v25  ;;  %v1107_v40 = vpop.f32.mrf.mxu0  ;;  %p1202_p4 = por %p1201_p3, %p1200_p2 }
 0x109   : > { %v760_v30 = vsel %vm1515_vm2, %v681_v26, 0.0  ;;  %v725_v39 = vadd.f32 %v724_v34, %v723_v31 }
 0x10a   : > { %v767_v32 = vmul.f32 %v760_v30, %v760_v30  ;;  %v655_v42 = vpop.f32.mrf.mxu0  ;;  %p1203_p5 = pnand %p1202_p4, %p1196_p1 }
 0x10b   : > { %1191 = vrsqrt.f32 %v725_v39  ;;  %vm728_vm4 = vcmp.eq.f32.partialorder %v725_v39, inf  ;;  %v731_v49 = vand.u32 2147483648, %v725_v39  ;;  %vm730_vm5 = vcmp.eq.f32.partialorder %v725_v39, 0.0 }
 0x10c   : > { %v772_v35 = vsel %vm771_vm3, %v767_v32, 0.0  ;;  %v1110_v43 = vpop.f32.mrf.mxu0 }
 0x10d   : > { %v773_v38 = vadd.f32 %v772_v35, %v770_v33 }
 0x10f   : > { %774 = vadd.xlane.f32.xlu0 %v773_v38 }
 0x114   : > { %502 = vperm.xlu1 %1190, %v469_v37  }
 0x118   : > { %v1192_v44 = vpop.eup %1191 }
 0x119   : > { %v727_v47 = vmul.f32 %v1192_v44, %v725_v39 }
 0x11b   : > { %v729_v48 = vsel %vm728_vm4, %v725_v39, %v727_v47 }
 0x11c   : > { %v732_v50 = vsel %vm730_vm5, %v731_v49, %v729_v48 }
 0x11d   : > { %v733_v51 = vadd.f32 1e-06, %v732_v50 }
 0x11f   : > { %v744_v52 = vsel %vm1515_vm2, %v733_v51, 0.0 }
 0x120   : > { %v751_v53 = vmul.f32 %v744_v52, %v733_v51  ;;  %v746_v55 = vsel %vm745_vm6, %v744_v52, 0.0 }
 0x122   : > { %v752_v54 = vsel %vm745_vm6, %v751_v53, 0.0 }
 0x125   : > { %497 = vperm.xlu0 %1189, %v468_v46  }
 0x138   : > { %753 = vadd.xlane.f32.xlu1 %v752_v54 }
 0x144   : > { %747 = vadd.xlane.f32.xlu0 %v746_v55 }
 0x15a   : > { %492 = vperm.xlu0 %1189, %v467_v56  }
 0x15b   : > { %1206 = shalt.err (!%p1203_p5)
}
 0x15c   : > { %s1207_s22 = scalar_lea.hbm %s1568_s11, 192  ;;  %s1211_s30 = scalar_lea.hbm %s1678_s5, 384 }
 0x15d   : > { %p1208_p7 = scmp.ne.s32.totalorder %s1568_s11, %s1207_s22  ;;  %p1212_p12 = scmp.lt.s32.totalorder %s1568_s11, %s1678_s5 }
 0x15e   : > { %p1213_p13 = scmp.lt.s32.totalorder %s1211_s30, %s1207_s22 }
 0x15f   : > { %p1209_p10 = pnand %p1208_p7, %p1393_p6 }
 0x160   : > { %p1214_p0 = por %p1213_p13, %p1212_p12 }
 0x161   : > { %p1210_p11 = pneg %p1209_p10 }
 0x163   : > { %p1215_p1 = pnand %p1214_p0, %p1210_p11 }
 0x165   : > { %1218 = shalt.err (!%p1215_p1)
}
 0x166   : > { %s1686_s13 = smov 64   ;;  %s1687_s15 = smov 128   ;;  %vm749_vm7 = vcmask 7172   ;;  %vm784_vm8 = vcmask 0  }
 0x167   : > { %s1688_s4 = smov 4   ;;  %s1695_s29 = smul.u32 12, %s1412_s14 }
 0x168   : > { %1139 = dma.vmem_to_hbm [thread:$0]  (%p1393_p6), %s1560_s16, 192, %s1568_s11, %s802_s12, %s1686_s13, %s1687_s15, %s1688_s4  }
 0x169   : > { %s1600_s16 = scalar_lea.vmem [#allocation7], %s1695_s29  ;;  %p436_p2 = scmp.lt.s32.totalorder %s1375_s3, 1 }
 0x16a   : > { %s848_s13 = sshll.u32 %s1600_s16, 4  ;;  %s1696_s15 = sshll.u32 %s1375_s3, 6  ;;  %s1620_s13 = int_to_ptr.vmem [resolvable:$true] %s848_s13 }
 0x16b   : > { %s437_s23 = scalar_select %p436_p2, %s1375_s3, 1 }
 0x16c   : > { %s1627_s0 = scalar_lea.hbm %s1679_s6, %s1696_s15 }
 0x16d   : > { %s1051_s11 = sshll.u32 %s437_s23, 2  ;;  %s446_s12 = scalar_lea.vmem %s1682_s9, %s437_s23 }
 0x16e   : > { %s443_s27 = scalar_lea.vmem %s1681_s8, %s1051_s11  ;;  %s439_s29 = scalar_lea.vmem %s1680_s7, %s1051_s11 }
 0x16f   : > { %s449_s28 = scalar_lea.vmem %s1683_s10, %s437_s23  ;;  %s807_s23 = scalar_lea.sflag [#allocation8], %s1412_s14 }
 0x170   : > { %s1292_s11 = smov [#allocation7]  }
 0x18c   : > { %v791_v45 = vpop.xlane.xlu1 %790 }
 0x18d   : > { %v792_v57 = vrot.slane %v791_v45, 4 }
 0x18f   : > { %v793_v58 = vadd.f32 %v792_v57, %v791_v45 }
 0x190   : > { %v503_v59 = vpop.permute.xlu1 %502 }
 0x191   : > { %v794_v60 = vrot.slane %v793_v58, 2  ;;  %v656_v62 = vadd.f32 %v655_v42, %v503_v59 }
 0x193   : > { %v795_v1 = vadd.f32 %v794_v60, %v793_v58  ;;  %v702_v2 = vmul.f32 %v1512_v41, %v656_v62 }
 0x195   : > { %v796_v6 = vrot.slane %v795_v1, 1  ;;  %v704_v7 = vrot.slane %v702_v2, 4 }
 0x197   : > { %v797_v12 = vadd.f32 %v796_v6, %v795_v1 }
 0x198   : > { %v775_v61 = vpop.xlane.xlu0 %774 }
 0x199   : > { %v776_v63 = vrot.slane %v775_v61, 4 }
 0x19b   : > { %v777_v0 = vadd.f32 %v776_v63, %v775_v61 }
 0x19d   : > { %v778_v3 = vrot.slane %v777_v0, 2 }
 0x19f   : > { %v779_v4 = vadd.f32 %v778_v3, %v777_v0 }
 0x1a0   : > { %v498_v5 = vpop.permute.xlu0 %497 }
 0x1a1   : > { %v651_v8 = vadd.f32 %v1546_v36, %v498_v5  ;;  %v780_v9 = vrot.slane %v779_v4, 1 }
 0x1a3   : > { %v707_v10 = vadd.f32 %v704_v7, %v651_v8  ;;  %v781_v11 = vadd.f32 %v780_v9, %v779_v4  ;;  %v697_v16 = vmul.f32 %v1512_v41, %v651_v8 }
 0x1a5   : > { %1067 = vst [vmem:[%s1600_s16 + $0x8] sm:$0xf] %v707_v10  ;;  %1135 = vpush %v781_v11  ;;  %v699_v18 = vrot.slane %v697_v16, 4 }
 0x1a6   : > { %1137 = vpush %v797_v12 }
 0x1c1   : > { %v754_v14 = vpop.xlane.xlu1 %753 }
 0x1c2   : > { %755 = vst.msk [vmem:[%s443_s27 - $0x4] sm:$0xf0] %vm749_vm7, %v754_v14  ;;  %s1223_s27 = sshll.u32 %s1292_s11, 4  ;;  %s1224_s27 = int_to_ptr.vmem [resolvable:$false] %s1223_s27 }
 0x1c3   : > { %p1226_p7 = scmp.lt.s32.totalorder %s1620_s13, %s1224_s27 }
 0x1cd   : > { %v748_v15 = vpop.xlane.xlu0 %747 }
 0x1ce   : > { %750 = vst.msk [vmem:[%s439_s29 - $0x4] sm:$0xf0] %vm749_vm7, %v748_v15 }
 0x1d5   : > { %v493_v17 = vpop.permute.xlu0 %492 }
 0x1d6   : > { %v646_v19 = vadd.f32 %v1537_v13, %v493_v17  ;;  %s1136_s22 = spop %1135 }
 0x1d7   : > { %v783_v41 = vstv %s1136_s22  ;;  %s1138_s30 = spop %1137  ;;  %s1219_s22 = scalar_lea.vmem %s1620_s13, 192 }
 0x1d8   : > { %v701_v20 = vadd.f32 %v699_v18, %v646_v19  ;;  %v706_v21 = vadd.f32 %v704_v7, %v646_v19  ;;  %785 = vst.msk [vmem:[%s446_s12] sm:$0x1] %vm784_vm8, %v783_v41  ;;  %v799_v22 = vstv %s1138_s30  ;;  %p1220_p3 = scmp.ne.s32.totalorder %s1620_s13, %s1219_s22  ;;  %s1225_s12 = scalar_lea.vmem %s1224_s27, 384 }
 0x1d9   : > { %800 = vst.msk [vmem:[%s449_s28] sm:$0x1] %vm784_vm8, %v799_v22  ;;  %p1227_p10 = scmp.lt.s32.totalorder %s1225_s12, %s1219_s22 }
 0x1da   : > { %709 = vst [vmem:[%s1600_s16] sm:$0xf] %v701_v20  ;;  %1065 = vst [vmem:[%s1600_s16] sm:$0xf0] %v706_v21  ;;  %p1221_p4 = pnand %p1220_p3, %p1393_p6 }
 0x1db   : > { %p1228_p11 = por %p1227_p10, %p1226_p7 }
 0x1dc   : > { %p1222_p5 = pneg %p1221_p4 }
 0x1de   : > { %p1229_p12 = pnand %p1228_p11, %p1222_p5 }
 0x1e0   : > { %1232 = shalt.err (!%p1229_p12)
}
 0x1e1   : > { %s1233_s3 = scalar_lea.hbm %s1627_s0, 192  ;;  %s1237_s28 = scalar_lea.hbm %s1679_s6, 384 }
 0x1e2   : > { %p1234_p13 = scmp.ne.s32.totalorder %s1627_s0, %s1233_s3  ;;  %p1238_p2 = scmp.lt.s32.totalorder %s1627_s0, %s1679_s6 }
 0x1e3   : > { %p1239_p3 = scmp.lt.s32.totalorder %s1237_s28, %s1233_s3 }
 0x1e4   : > { %p1235_p0 = pnand %p1234_p13, %p1393_p6 }
 0x1e5   : > { %p1240_p4 = por %p1239_p3, %p1238_p2 }
 0x1e6   : > { %p1236_p1 = pneg %p1235_p0 }
 0x1e8   : > { %p1241_p5 = pnand %p1240_p4, %p1236_p1 }
 0x1ea   : > { %1244 = shalt.err (!%p1241_p5)
}
 0x1eb   : > { %s1697_s4 = smov 4   ;;  %s1698_s29 = smov 128  }
 0x1ec   : > { %s1699_s22 = smov 64  }
 0x1ed   : > { %1140 = dma.vmem_to_hbm [thread:$0]  (%p1393_p6), %s1620_s13, 192, %s1627_s0, %s807_s23, %s1699_s22, %s1698_s29, %s1697_s4  }
 0x1ee PF: > { %s875_s11 = sand.u32 1, %s1271_s17   ;;  %p1144_p7 = pnand %p1048_p9, %p1397_p8 }
 0x1ef   : > { %s876_s27 = scalar_lea.sflag [#allocation6], %s875_s11 }
 0x1f0   : > { %p1145_p10 = pneg %p1144_p7 }
 0x1f2   : > { %1262 = dma.done.wait (%p1145_p10), %s876_s27, 192  }
 0x1f3   : > { %1264 = vsyncadd (%p1145_p10), %s876_s27, 4294967104  ;;  %s885_s12 = scalar_lea.sflag [#allocation8], %s875_s11 }
 0x1f4   : > { %1266 = dma.done.wait (%p1145_p10), %s885_s12, 192  }
 0x1f5   : > { %1268 = vsyncadd (%p1145_p10), %s885_s12, 4294967104  ;;  %p26_p6 = scmp.ge.s32.totalorder %s1379_s21, 4   ;;  %s1700_s17 = smov %s1275_s18 }
 0x1f6   : > { %s1701_s18 = smov %s1279_s19  ;;  %s1702_s19 = smov %s1391_s24 }
 0x1f7   : > { %s1703_s20 = smov %s1379_s21  ;;  %28 = sbr.rel (!%p26_p6) target bundleno = 9 (0x9), region = 187 }
 0x1fc   :  { %916 = vsyncpa [#allocation6], 1 }
 0x1fd   :  { %918 = vsyncpa [#allocation6 + $0x1], 1 }
 0x1fe   :  { %919 = vsyncpa [#allocation8], 1 }
 0x1ff   :  { %921 = vsyncpa [#allocation8 + $0x1], 1 }

</bundles_post_ra>
